<compile_context>
chip_gen: v7x
topology: tpu7x:2x2x1
jax: 0.10.0
libtpu: 0.0.40
codegen_flags: <defaults>
</compile_context>

<pallas_src>
import functools
import math

import jax
import jax.numpy as jnp
from jax import lax
from jax.experimental import pallas as pl
from jax.experimental.pallas import tpu as pltpu


def _rmsnorm_kernel(x_ref, w_ref, o_ref, *, eps: float, inv_dim: float):
    # Hot path: square (VPU), sum over lanes (XLU), rsqrt (EUP), scale (VPU).
    x = x_ref[...].astype(jnp.float32)                     # [tile_rows, dim]
    ss = jnp.sum(x * x, axis=-1, keepdims=True)            # [tile_rows, 1]
    inv = lax.rsqrt(ss * inv_dim + eps)                    # mean folded as sum*inv_dim
    w = w_ref[...].astype(jnp.float32)                     # [1, dim]
    o_ref[...] = ((x * inv) * w).astype(o_ref.dtype)       # type_as(x)


def _vmem_capacity_bytes() -> int:
    """Per-core VMEM capacity; conservative 64 MiB (v7x) fallback."""
    cap = 64 * 1024 * 1024
    try:
        cap = int(pltpu.get_tpu_info().vmem_capacity_bytes)
    except Exception:
        pass
    return cap


def _pick_tile_rows(rows: int, dim: int, itemsize: int, budget_bytes: int) -> int:
    # Sublane packing granularity: 8 for f32, 16 for bf16, 32 for int8/fp8.
    pack = max(8, 32 // max(itemsize, 1))
    # Per-row VMEM: double-buffered input + output tiles plus ~3 f32 working
    # copies created by the body (x_f32, x*x, scaled product).
    per_row = dim * (4 * itemsize + 3 * 4)
    max_rows = max(pack, budget_bytes // max(per_row, 1))
    tile = pack
    while tile * 2 <= min(max_rows, 1024):
        tile *= 2
    # Never exceed the pack-rounded row count (small inputs → one full tile).
    rows_rounded = pl.cdiv(rows, pack) * pack
    return min(tile, rows_rounded)


def rmsnorm(x: jax.Array, weight: jax.Array, eps: float = 1e-6,
            *, tile_rows: int | None = None) -> jax.Array:
    """RMSNorm over the last axis of x. weight has shape (dim,)."""
    orig_shape = x.shape
    dim = orig_shape[-1]
    rows = math.prod(orig_shape[:-1]) if len(orig_shape) > 1 else 1

    x2d = x.reshape(rows, dim)
    w2d = weight.reshape(1, dim)

    cap = _vmem_capacity_bytes()
    if tile_rows is None:
        # Use about half of VMEM for the tile working set.
        tile_rows = _pick_tile_rows(rows, dim, x.dtype.itemsize, cap // 2)

    # Pad rows up to a tile multiple instead of asserting divisibility.
    rows_padded = pl.cdiv(rows, tile_rows) * tile_rows
    if rows_padded != rows:
        x2d = jnp.pad(x2d, ((0, rows_padded - rows), (0, 0)))

    # Raise the scoped VMEM limit so the large tiles compile; stay under
    # physical capacity with headroom.
    vmem_limit = max(32 * 1024 * 1024, min(cap * 3 // 4, 100 * 1024 * 1024))

    kernel = functools.partial(_rmsnorm_kernel, eps=float(eps), inv_dim=1.0 / dim)

    out2d = pl.pallas_call(
        kernel,
        out_shape=jax.ShapeDtypeStruct((rows_padded, dim), x.dtype),
        grid_spec=pltpu.PrefetchScalarGridSpec(
            num_scalar_prefetch=0,
            grid=(rows_padded // tile_rows,),
            in_specs=[
                pl.BlockSpec((tile_rows, dim), lambda i: (i, 0)),  # x tile
                pl.BlockSpec((1, dim), lambda i: (0, 0)),          # weight (shared)
            ],
            out_specs=pl.BlockSpec((tile_rows, dim), lambda i: (i, 0)),
        ),
        compiler_params=pltpu.CompilerParams(
            dimension_semantics=("parallel",),   # shards rows across TCs on v7x
            vmem_limit_bytes=vmem_limit,
        ),
    )(x2d, w2d)

    if rows_padded != rows:
        out2d = out2d[:rows]
    return out2d.reshape(orig_shape)


def _reference_rmsnorm(x, weight, eps=1e-6):
    xf = x.astype(jnp.float32)
    out = xf * lax.rsqrt(jnp.mean(xf * xf, axis=-1, keepdims=True) + eps)
    return (out * weight.astype(jnp.float32)).astype(x.dtype)


if __name__ == "__main__":
    key = jax.random.PRNGKey(0)
    k1, k2, k3 = jax.random.split(key, 3)

    # Case 1: bf16 input (exercises .float() / .type_as(x) cast semantics),
    # weight = ones as in nn.Parameter(torch.ones(dim)).
    batch, seq, hidden = 2, 8, 32
    x = jax.random.normal(k1, (batch, seq, hidden), dtype=jnp.float32).astype(jnp.bfloat16)
    weight = jnp.ones((hidden,), dtype=jnp.float32)

    out = rmsnorm(x, weight, eps=1e-6)
    out = jax.block_until_ready(out)
    ref = _reference_rmsnorm(x, weight, eps=1e-6)
    assert out.shape == x.shape and out.dtype == x.dtype
    assert jnp.allclose(out.astype(jnp.float32), ref.astype(jnp.float32),
                        atol=1e-2, rtol=1e-2)

    # Case 2: f32 input with a row count that is NOT a tile multiple
    # (exercises the padding / cdiv path) and a non-trivial weight.
    x2 = jax.random.normal(k2, (3, 5, 128), dtype=jnp.float32)
    w2 = 1.0 + 0.1 * jax.random.normal(k3, (128,), dtype=jnp.float32)
    out2 = jax.block_until_ready(rmsnorm(x2, w2, eps=1e-6))
    ref2 = _reference_rmsnorm(x2, w2, eps=1e-6)
    assert out2.shape == x2.shape and out2.dtype == x2.dtype
    assert jnp.allclose(out2, ref2, atol=1e-5, rtol=1e-5)

    print("KERNEL_OK")
</pallas_src>

<mosaic_0001>
module attributes {stable_mosaic.version = 11 : i64} {
  func.func @_rmsnorm_kernel(%arg0: i32, %arg1: memref<16x32xbf16, #tpu.memory_space<vmem>>, %arg2: memref<1x32xf32, #tpu.memory_space<vmem>>, %arg3: memref<16x32xbf16, #tpu.memory_space<vmem>>) attributes {dimension_semantics = [#tpu.dimension_semantics<parallel>], iteration_bounds = array<i64: 1>, scalar_prefetch = 0 : i64, scratch_operands = 0 : i64, tpu.core_type = #tpu.core_type<tc>, window_params = [{transform_indices = @transform_0, window_bounds = array<i64: 16, 32>}, {pipeline_mode = #tpu.pipeline_mode<synchronous>, transform_indices = @transform_1, window_bounds = array<i64: 1, 32>}, {transform_indices = @transform_2, window_bounds = array<i64: 16, 32>}]} {
    %c0 = arith.constant 0 : index
    %c0_0 = arith.constant 0 : index
    %0 = vector.load %arg1[%c0, %c0_0] : memref<16x32xbf16, #tpu.memory_space<vmem>>, vector<16x32xbf16>
    %1 = arith.extf %0 : vector<16x32xbf16> to vector<16x32xf32>
    %2 = arith.mulf %1, %1 : vector<16x32xf32>
    %cst = arith.constant dense<0.000000e+00> : vector<16xf32>
    %3 = vector.multi_reduction <add>, %2, %cst [1] : vector<16x32xf32> to vector<16xf32>
    %4 = vector.shape_cast %3 : vector<16xf32> to vector<16x1xf32>
    %cst_1 = arith.constant 3.125000e-02 : f32
    %5 = vector.broadcast %cst_1 : f32 to vector<16x1xf32>
    %6 = arith.mulf %4, %5 : vector<16x1xf32>
    %cst_2 = arith.constant 9.99999997E-7 : f32
    %7 = vector.broadcast %cst_2 : f32 to vector<16x1xf32>
    %8 = arith.addf %6, %7 : vector<16x1xf32>
    %9 = math.rsqrt %8 : vector<16x1xf32>
    %c0_3 = arith.constant 0 : index
    %c0_4 = arith.constant 0 : index
    %10 = vector.load %arg2[%c0_3, %c0_4] : memref<1x32xf32, #tpu.memory_space<vmem>>, vector<1x32xf32>
    %11 = vector.broadcast %9 : vector<16x1xf32> to vector<16x32xf32>
    %12 = arith.mulf %1, %11 : vector<16x32xf32>
    %13 = vector.broadcast %10 : vector<1x32xf32> to vector<16x32xf32>
    %14 = arith.mulf %12, %13 : vector<16x32xf32>
    %15 = arith.truncf %14 : vector<16x32xf32> to vector<16x32xbf16>
    %c0_5 = arith.constant 0 : index
    %c0_6 = arith.constant 0 : index
    %16 = vector.load %arg3[%c0_5, %c0_6] : memref<16x32xbf16, #tpu.memory_space<vmem>>, vector<16x32xbf16>
    tpu.vector_store %arg3[%c0_5, %c0_6], %15 {strides = array<i32>} : memref<16x32xbf16, #tpu.memory_space<vmem>>, vector<16x32xbf16>,
    return
  }
  func.func @transform_0(%arg0: i32) -> (i32, i32) {
    %c0_i32 = arith.constant 0 : i32
    %c0_i32_0 = arith.constant 0 : i32
    return %arg0, %c0_i32 : i32, i32
  }
  func.func @transform_1(%arg0: i32) -> (i32, i32) {
    %c0_i32 = arith.constant 0 : i32
    %c0_i32_0 = arith.constant 0 : i32
    %c0_i32_1 = arith.constant 0 : i32
    return %c0_i32, %c0_i32_0 : i32, i32
  }
  func.func @transform_2(%arg0: i32) -> (i32, i32) {
    %c0_i32 = arith.constant 0 : i32
    %c0_i32_0 = arith.constant 0 : i32
    return %arg0, %c0_i32 : i32, i32
  }
}

</mosaic_0001>

<bundles_post_ra>
// kernel: tpu_custom_call.1
= control target key start
LH: loop header
LB: loop body
LE: loop exit
PB: predicated region body
PF: predicated region fallthrough
CT: control target
= control target key end

     0   :  { %7 = vsyncpa [#allocation3], 0  ;;  %s201_s0 = inlined_call_operand.hbm [shape: bf16[16,32], index: 0, kind: input, shape index: {}]   ;;  %s202_s1 = inlined_call_operand.vmem [shape: f32[1,32], index: 1, kind: input, shape index: {}]   ;;  %s203_s2 = inlined_call_operand.hbm [shape: bf16[16,32], index: 2, kind: output, shape index: {}]  }
   0x1   :  { %8 = vsyncpa [#allocation4], 0  ;;  %s149_s9 = smov [#allocation2]   ;;  %s101_s13 = scalar_lea.hbm %s201_s0, 128 }
   0x2   :  { %s14_s10 = sshll.u32 %s149_s9, 4  ;;  %p102_p0 = scmp.ne.s32.totalorder %s201_s0, %s101_s13  ;;  %s15_s10 = int_to_ptr.vmem [resolvable:$true] %s14_s10 }
   0x3   :  { %p105_p1 = scmp.lt.u32.totalorder %s101_s13, %s201_s0 }
   0x5   :  { %p107_p2 = pnand %p105_p1, %p102_p0 }
   0x7   :  { %110 = shalt.err (!%p107_p2)
}
   0x8   :  { %s111_s18 = scalar_lea.vmem %s15_s10, 128  ;;  %p116_p4 = scmp.lt.s32.totalorder %s15_s10, %s15_s10 }
   0x9   :  { %p112_p3 = scmp.ne.s32.totalorder %s15_s10, %s111_s18  ;;  %p117_p5 = scmp.lt.s32.totalorder %s111_s18, %s111_s18 }
   0xb   :  { %p118_p6 = por %p117_p5, %p116_p4 }
   0xd   :  { %p119_p7 = pnand %p118_p6, %p112_p3 }
   0xf   :  { %122 = shalt.err (!%p119_p7)
}
  0x10   :  { %s150_s19 = smov 64   ;;  %s151_s20 = smov 4  }
  0x11   :  { %20 = dma.hbm_to_vmem [thread:$0]  %s201_s0, 128, %s15_s10, [#allocation3], %s150_s19, %s150_s19, %s151_s20  }
  0x12   :  { %145 = dma.done.wait [#allocation3], 128  }
  0x13   :  { %146 = vsyncadd [#allocation3], 4294967168  ;;  %v90_v0 = vld [vmem:[#allocation2] sm:$0xff]   ;;  %vm32_vm0 = vcmask 261120   ;;  %vm64_vm1 = vcmask 257024   ;;  %s152_s24 = smov [#allocation5]  }
  0x14   :  { %v91_v1 = vunpack.c.l.bf16 %v90_v0  ;;  %v92_v2 = vunpack.c.h.bf16 %v90_v0  ;;  %v84_v14 = vld [vmem:[%s202_s1] ss:$0 sm:$0xff]  ;;  %s72_s25 = sshll.u32 %s152_s24, 4  ;;  %s73_s25 = int_to_ptr.vmem [resolvable:$true] %s72_s25 }
  0x15   :  { %s123_s26 = scalar_lea.vmem %s73_s25, 128  ;;  %p128_p9 = scmp.lt.s32.totalorder %s73_s25, %s73_s25 }
  0x16   :  { %v30_v3 = vmul.f32 %v91_v1, %v91_v1  ;;  %v31_v4 = vmul.f32 %v92_v2, %v92_v2  ;;  %p124_p8 = scmp.ne.s32.totalorder %s73_s25, %s123_s26  ;;  %p129_p10 = scmp.lt.s32.totalorder %s123_s26, %s123_s26 }
  0x18   :  { %v33_v5 = vsel %vm32_vm0, %v30_v3, 0.0  ;;  %v36_v6 = vsel %vm32_vm0, %v31_v4, 0.0  ;;  %p130_p11 = por %p129_p10, %p128_p9 }
  0x19   :  { %34 = vadd.xlane.f32.xlu0 %v33_v5 }
  0x1a   :  { %p131_p12 = pnand %p130_p11, %p124_p8 }
  0x1d   :  { %37 = vadd.xlane.f32.xlu0 %v36_v6 }
  0xa6   :  { %v35_v7 = vpop.xlane.xlu0 %34 }
  0xa7   :  { %v39_v8 = vmul.f32 0.03125, %v35_v7 }
  0xa9   :  { %v41_v9 = vadd.f32 1e-06, %v39_v8 }
  0xaa   :  { %v38_v10 = vpop.xlane.xlu0 %37 }
  0xab   :  { %97 = vrsqrt.f32 %v41_v9  ;;  %v40_v11 = vmul.f32 0.03125, %v38_v10 }
  0xad   :  { %v42_v12 = vadd.f32 1e-06, %v40_v11 }
  0xaf   :  { %99 = vrsqrt.f32 %v42_v12 }
  0xb5   :  { %v98_v13 = vpop.eup %97 }
  0xb6   :  { %v46_v15 = vmul.f32 %v98_v13, %v91_v1 }
  0xb8   :  { %v54_v16 = vmul.f32 %v84_v14, %v46_v15 }
  0xb9   :  { %v100_v17 = vpop.eup %99 }
  0xba   :  { %v47_v18 = vmul.f32 %v100_v17, %v92_v2  ;;  %v87_v19 = vpack.c.bf16 %v54_v16, %v54_v16 }
  0xbc   :  { %v55_v20 = vmul.f32 %v84_v14, %v47_v18  ;;  %65 = vst.msk [vmem:[#allocation5] sm:$0xf] %vm64_vm1, %v87_v19 }
  0xbe   :  { %v88_v21 = vpack.c.bf16 %v55_v20, %v55_v20 }
  0xc0   :  { %66 = vst.msk [vmem:[#allocation5 + $0x4] sm:$0xf] %vm64_vm1, %v88_v21 }
  0xc1   :  { %134 = shalt.err (!%p131_p12)
}
  0xc2   :  { %s135_s28 = scalar_lea.hbm %s203_s2, 128 }
  0xc3   :  { %p136_p13 = scmp.ne.s32.totalorder %s203_s2, %s135_s28  ;;  %p139_p0 = scmp.lt.u32.totalorder %s135_s28, %s203_s2 }
  0xc5   :  { %p141_p1 = pnand %p139_p0, %p136_p13 }
  0xc7   :  { %144 = shalt.err (!%p141_p1)
}
  0xc8   :  { %78 = dma.vmem_to_hbm [thread:$0]  %s73_s25, 128, %s203_s2, [#allocation4], %s150_s19, %s150_s19, %s151_s20  }
  0xc9   :  { %147 = dma.done.wait [#allocation4], 128  }
  0xca   :  { %148 = vsyncadd [#allocation4], 4294967168 }
  0xcb   :  { %82 = vsyncpa [#allocation3], 1 }
  0xcc   :  { %83 = vsyncpa [#allocation4], 1 }

</bundles_post_ra>
